<compile_context>
chip_gen: v5e
topology: v5e:2x2
jax: 0.10.0
libtpu: 0.0.40
codegen_flags: <defaults>
</compile_context>

<pallas_src>
import functools
import math

import jax
import jax.numpy as jnp
from jax.experimental import pallas as pl
from jax.experimental.pallas import tpu as pltpu


def _choose_group_size(num_heads, head_dim, target=256):
    """Smallest divisor g of H with g*D >= target (MXU tile), else H."""
    for g in range(1, num_heads + 1):
        if num_heads % g == 0 and g * head_dim >= target:
            return g
    return num_heads


def _mhsa_kernel(x_ref, wqkv_ref, bqkv_ref, wo_ref, bo_ref,
                 out_ref, attn_ref, o_slab_ref, *, group_size, head_dim):
    """One grid step = one (batch element, group of `group_size` heads)."""
    g = pl.program_id(1)
    G, D = group_size, head_dim
    GD = G * D

    x = x_ref[0]                                    # (T, C)   bf16
    w_g = wqkv_ref[g]                               # (C, 3GD) bf16, VMEM-resident
    b_g = bqkv_ref[g]                               # (1, 3GD) f32

    # Fused per-group QKV projection: one well-shaped MXU pass, f32 accumulate.
    qkv = jnp.dot(x, w_g, preferred_element_type=jnp.float32) + b_g   # (T, 3GD)
    q = qkv[:, :GD]                # 1/sqrt(D) already folded into Wq/bq host-side
    k = qkv[:, GD:2 * GD].astype(jnp.bfloat16)
    v = qkv[:, 2 * GD:].astype(jnp.bfloat16)

    # Per-head attention (unrolled: G is a small Python constant).
    for hg in range(G):
        lo = hg * D
        q_h = q[:, lo:lo + D].astype(jnp.bfloat16)
        k_h = k[:, lo:lo + D]
        v_h = v[:, lo:lo + D]

        # scores = q @ k^T via dot_general (contract feature dims, no transpose).
        scores = jax.lax.dot_general(q_h, k_h, (((1,), (1,)), ((), ())),
                                     preferred_element_type=jnp.float32)  # (T, T)
        scores = scores - jnp.max(scores, axis=-1, keepdims=True)
        e = jnp.exp(scores)
        attn = e * pl.reciprocal(jnp.sum(e, axis=-1, keepdims=True), approx=True)
        attn_ref[0, hg] = attn.astype(attn_ref.dtype)                   # bf16 writeback

        # Head output stacked into the (T, GD) slab for one grouped out-proj matmul.
        o_slab_ref[:, lo:lo + D] = jnp.dot(attn.astype(jnp.bfloat16), v_h,
                                           preferred_element_type=jnp.float32)

    # Output projection accumulated over head groups directly into out_ref
    # (its block index (b, 0, 0) is constant over g => VMEM-resident).
    @pl.when(g == 0)
    def _():
        out_ref[0] = jnp.broadcast_to(bo_ref[...], out_ref.shape[1:])

    out_ref[0] += jnp.dot(o_slab_ref[...].astype(jnp.bfloat16), wo_ref[g],
                          preferred_element_type=jnp.float32)


def multi_head_self_attention(x, params, num_heads, *, attn_dtype=jnp.bfloat16):
    """x: (B, T, C) float32.  Returns (out (B,T,C) f32, attn (B,H,T,T) attn_dtype)."""
    B, T, C = x.shape
    H = num_heads
    D = C // H
    G = _choose_group_size(H, D)
    NG = H // G
    GD = G * D
    scale = 1.0 / math.sqrt(D)

    # ---- host-side weight packing (layout plumbing, done once) ----
    # Fold 1/sqrt(D) into the Q projection (exact in f32).
    wq = params["wq"] * scale
    bq = params["bq"] * scale

    def group_cols(w):                       # (C, C) -> (NG, C, GD), heads contiguous
        return w.reshape(C, NG, GD).transpose(1, 0, 2)

    wqkv = jnp.concatenate([group_cols(wq),
                            group_cols(params["wk"]),
                            group_cols(params["wv"])], axis=-1).astype(jnp.bfloat16)

    def group_bias(b):                       # (1, C) -> (NG, 1, GD)
        return b.reshape(NG, 1, GD)

    bqkv = jnp.concatenate([group_bias(bq),
                            group_bias(params["bk"]),
                            group_bias(params["bv"])], axis=-1)        # (NG,1,3GD) f32

    wo = params["wo"].reshape(NG, GD, C).astype(jnp.bfloat16)           # per-group Wo rows
    bo = params["bo"]                                                    # (1, C) f32

    kernel = functools.partial(_mhsa_kernel, group_size=G, head_dim=D)

    out, attn = pl.pallas_call(
        kernel,
        out_shape=(
            jax.ShapeDtypeStruct((B, T, C), jnp.float32),
            jax.ShapeDtypeStruct((B, H, T, T), attn_dtype),
        ),
        grid_spec=pltpu.PrefetchScalarGridSpec(
            num_scalar_prefetch=0,
            grid=(B, NG),
            in_specs=[
                pl.BlockSpec((1, T, C), lambda b, g: (b, 0, 0)),           # x (per batch)
                # Constant-index full-array specs: weights DMA'd once, VMEM-resident.
                pl.BlockSpec((NG, C, 3 * GD), lambda b, g: (0, 0, 0)),     # fused QKV W
                pl.BlockSpec((NG, 1, 3 * GD), lambda b, g: (0, 0, 0)),     # fused QKV bias
                pl.BlockSpec((NG, GD, C), lambda b, g: (0, 0, 0)),         # Wo rows
                pl.BlockSpec((1, C), lambda b, g: (0, 0)),                 # bo
            ],
            out_specs=[
                pl.BlockSpec((1, T, C), lambda b, g: (b, 0, 0)),           # out (acc over g)
                pl.BlockSpec((1, G, T, T), lambda b, g: (b, g, 0, 0)),     # attn
            ],
            scratch_shapes=[pltpu.VMEM((T, GD), jnp.float32)],             # head-output slab
        ),
        compiler_params=pltpu.CompilerParams(
            # b is "parallel" (megacore); g is the reduction axis for out -> "arbitrary".
            dimension_semantics=("parallel", "arbitrary"),
            # 40 MiB leaves headroom on v7x (64 MiB physical); plenty on v5e/v6e.
            vmem_limit_bytes=40 * 1024 * 1024,
        ),
    )(x.astype(jnp.bfloat16), wqkv, bqkv, wo, bo)
    return out, attn


def init_params(key, embed_dim):
    """Deterministic synthetic parameters (PyTorch Linear shapes, pre-transposed)."""
    ks = jax.random.split(key, 8)
    scale = 1.0 / math.sqrt(embed_dim)

    def w(k):
        # PyTorch weight is (out, in); store transposed (in, out) for x @ W.
        return jax.random.uniform(k, (embed_dim, embed_dim), jnp.float32,
                                  -scale, scale)

    def b(k):
        return jax.random.uniform(k, (1, embed_dim), jnp.float32, -scale, scale)

    return {
        "wq": w(ks[0]), "bq": b(ks[1]),
        "wk": w(ks[2]), "bk": b(ks[3]),
        "wv": w(ks[4]), "bv": b(ks[5]),
        "wo": w(ks[6]), "bo": b(ks[7]),
    }


def _reference(x, params, num_heads):
    B, T, C = x.shape
    D = C // num_heads
    q = x @ params["wq"] + params["bq"]
    k = x @ params["wk"] + params["bk"]
    v = x @ params["wv"] + params["bv"]

    def split(a):
        return a.reshape(B, T, num_heads, D).transpose(0, 2, 1, 3)

    q, k, v = split(q), split(k), split(v)
    scores = jnp.einsum("bhqd,bhkd->bhqk", q, k) / math.sqrt(D)
    attn = jax.nn.softmax(scores, axis=-1)
    o = jnp.einsum("bhqk,bhkd->bhqd", attn, v)
    o = o.transpose(0, 2, 1, 3).reshape(B, T, C)
    return o @ params["wo"] + params["bo"], attn


if __name__ == "__main__":
    B, T, C, H = 2, 8, 32, 4

    key = jax.random.PRNGKey(0)
    kx, kp = jax.random.split(key)
    x = jax.random.normal(kx, (B, T, C), jnp.float32)
    params = init_params(kp, C)

    out, attn = multi_head_self_attention(x, params, H)
    out = jax.block_until_ready(out)
    attn = jax.block_until_ready(attn)

    ref_out, ref_attn = _reference(x, params, H)
    assert out.shape == (B, T, C) and attn.shape == (B, H, T, T)
    # bf16 MXU operands + bf16 attn writeback + approx reciprocal => relaxed tolerance
    # (the perf review explicitly calls for loosening the original 1e-5 check).
    assert jnp.allclose(out, ref_out, atol=2e-2, rtol=2e-2)
    assert jnp.allclose(attn.astype(jnp.float32), ref_attn, atol=2e-2, rtol=2e-2)

    print("KERNEL_OK")
</pallas_src>

<mosaic_0001>
module attributes {stable_mosaic.version = 11 : i64} {
  func.func @_mhsa_kernel(%arg0: i32, %arg1: i32, %arg2: memref<1x8x32xbf16, #tpu.memory_space<vmem>>, %arg3: memref<1x32x96xbf16, #tpu.memory_space<vmem>>, %arg4: memref<1x1x96xf32, #tpu.memory_space<vmem>>, %arg5: memref<1x32x32xbf16, #tpu.memory_space<vmem>>, %arg6: memref<1x32xf32, #tpu.memory_space<vmem>>, %arg7: memref<1x8x32xf32, #tpu.memory_space<vmem>>, %arg8: memref<1x4x8x8xbf16, #tpu.memory_space<vmem>>, %arg9: memref<8x32xf32, #tpu.memory_space<vmem>>) attributes {dimension_semantics = [#tpu.dimension_semantics<parallel>, #tpu.dimension_semantics<arbitrary>], iteration_bounds = array<i64: 2, 1>, scalar_prefetch = 0 : i64, scratch_operands = 1 : i64, tpu.core_type = #tpu.core_type<tc>, window_params = [{transform_indices = @transform_0, window_bounds = array<i64: 1, 8, 32>}, {pipeline_mode = #tpu.pipeline_mode<synchronous>, transform_indices = @transform_1, window_bounds = array<i64: 1, 32, 96>}, {pipeline_mode = #tpu.pipeline_mode<synchronous>, transform_indices = @transform_2, window_bounds = array<i64: 1, 1, 96>}, {pipeline_mode = #tpu.pipeline_mode<synchronous>, transform_indices = @transform_3, window_bounds = array<i64: 1, 32, 32>}, {pipeline_mode = #tpu.pipeline_mode<synchronous>, transform_indices = @transform_4, window_bounds = array<i64: 1, 32>}, {transform_indices = @transform_5, window_bounds = array<i64: 1, 8, 32>}, {transform_indices = @transform_6, window_bounds = array<i64: 1, 4, 8, 8>}]} {
    %c0 = arith.constant 0 : index
    %c0_0 = arith.constant 0 : index
    %c0_1 = arith.constant 0 : index
    %0 = vector.load %arg2[%c0, %c0_0, %c0_1] : memref<1x8x32xbf16, #tpu.memory_space<vmem>>, vector<1x8x32xbf16>
    %1 = vector.shape_cast %0 : vector<1x8x32xbf16> to vector<8x32xbf16>
    %2 = arith.index_cast %arg1 : i32 to index
    %c0_2 = arith.constant 0 : index
    %c0_3 = arith.constant 0 : index
    %3 = vector.load %arg3[%2, %c0_2, %c0_3] : memref<1x32x96xbf16, #tpu.memory_space<vmem>>, vector<1x32x96xbf16>
    %4 = vector.shape_cast %3 : vector<1x32x96xbf16> to vector<32x96xbf16>
    %5 = arith.index_cast %arg1 : i32 to index
    %c0_4 = arith.constant 0 : index
    %c0_5 = arith.constant 0 : index
    %6 = vector.load %arg4[%5, %c0_4, %c0_5] : memref<1x1x96xf32, #tpu.memory_space<vmem>>, vector<1x1x96xf32>
    %7 = vector.shape_cast %6 : vector<1x1x96xf32> to vector<1x96xf32>
    %cst = arith.constant dense<0.000000e+00> : vector<8x96xf32>
    %8 = tpu.matmul %1, %4, %cst {dimension_numbers = #tpu.dot_dimension_numbers<[1], [0], [0], [1], [0, 0, 1, 1], [], []>} : vector<8x32xbf16>, vector<32x96xbf16>, vector<8x96xf32> -> vector<8x96xf32>
    %9 = vector.broadcast %7 : vector<1x96xf32> to vector<8x96xf32>
    %10 = arith.addf %8, %9 : vector<8x96xf32>
    %11 = vector.extract_strided_slice %10 {offsets = [0, 0], sizes = [8, 32], strides = [1, 1]} : vector<8x96xf32> to vector<8x32xf32>
    %12 = vector.extract_strided_slice %10 {offsets = [0, 32], sizes = [8, 32], strides = [1, 1]} : vector<8x96xf32> to vector<8x32xf32>
    %13 = arith.truncf %12 : vector<8x32xf32> to vector<8x32xbf16>
    %14 = vector.extract_strided_slice %10 {offsets = [0, 64], sizes = [8, 32], strides = [1, 1]} : vector<8x96xf32> to vector<8x32xf32>
    %15 = arith.truncf %14 : vector<8x32xf32> to vector<8x32xbf16>
    %16 = vector.extract_strided_slice %11 {offsets = [0, 0], sizes = [8, 8], strides = [1, 1]} : vector<8x32xf32> to vector<8x8xf32>
    %17 = arith.truncf %16 : vector<8x8xf32> to vector<8x8xbf16>
    %18 = vector.extract_strided_slice %13 {offsets = [0, 0], sizes = [8, 8], strides = [1, 1]} : vector<8x32xbf16> to vector<8x8xbf16>
    %19 = vector.extract_strided_slice %15 {offsets = [0, 0], sizes = [8, 8], strides = [1, 1]} : vector<8x32xbf16> to vector<8x8xbf16>
    %cst_6 = arith.constant dense<0.000000e+00> : vector<8x8xf32>
    %20 = tpu.matmul %17, %18, %cst_6 {dimension_numbers = #tpu.dot_dimension_numbers<[1], [1], [0], [0], [0, 0, 1, 0], [], []>} : vector<8x8xbf16>, vector<8x8xbf16>, vector<8x8xf32> -> vector<8x8xf32>
    %cst_7 = arith.constant dense<0xFF800000> : vector<8xf32>
    %21 = vector.multi_reduction <maximumf>, %20, %cst_7 [1] : vector<8x8xf32> to vector<8xf32>
    %22 = vector.shape_cast %21 : vector<8xf32> to vector<8x1xf32>
    %23 = vector.broadcast %22 : vector<8x1xf32> to vector<8x8xf32>
    %24 = arith.subf %20, %23 : vector<8x8xf32>
    %25 = math.exp %24 : vector<8x8xf32>
    %cst_8 = arith.constant dense<0.000000e+00> : vector<8xf32>
    %26 = vector.multi_reduction <add>, %25, %cst_8 [1] : vector<8x8xf32> to vector<8xf32>
    %27 = vector.shape_cast %26 : vector<8xf32> to vector<8x1xf32>
    %28 = tpu.reciprocal %27 {approx = true} : vector<8x1xf32> -> vector<8x1xf32>
    %29 = vector.broadcast %28 : vector<8x1xf32> to vector<8x8xf32>
    %30 = arith.mulf %25, %29 : vector<8x8xf32>
    %31 = arith.truncf %30 : vector<8x8xf32> to vector<8x8xbf16>
    %c0_9 = arith.constant 0 : index
    %c0_10 = arith.constant 0 : index
    %c0_11 = arith.constant 0 : index
    %c0_12 = arith.constant 0 : index
    %32 = vector.load %arg8[%c0_9, %c0_10, %c0_11, %c0_12] : memref<1x4x8x8xbf16, #tpu.memory_space<vmem>>, vector<1x1x8x8xbf16>
    %33 = vector.shape_cast %32 : vector<1x1x8x8xbf16> to vector<8x8xbf16>
    %34 = vector.shape_cast %31 : vector<8x8xbf16> to vector<1x1x8x8xbf16>
    tpu.vector_store %arg8[%c0_9, %c0_10, %c0_11, %c0_12], %34 {strides = array<i32>} : memref<1x4x8x8xbf16, #tpu.memory_space<vmem>>, vector<1x1x8x8xbf16>,
    %35 = arith.truncf %30 : vector<8x8xf32> to vector<8x8xbf16>
    %cst_13 = arith.constant dense<0.000000e+00> : vector<8x8xf32>
    %36 = tpu.matmul %35, %19, %cst_13 {dimension_numbers = #tpu.dot_dimension_numbers<[1], [0], [0], [1], [0, 0, 1, 1], [], []>} : vector<8x8xbf16>, vector<8x8xbf16>, vector<8x8xf32> -> vector<8x8xf32>
    %c0_14 = arith.constant 0 : index
    %c0_15 = arith.constant 0 : index
    %37 = vector.load %arg9[%c0_14, %c0_15] : memref<8x32xf32, #tpu.memory_space<vmem>>, vector<8x8xf32>
    tpu.vector_store %arg9[%c0_14, %c0_15], %36 {strides = array<i32>} : memref<8x32xf32, #tpu.memory_space<vmem>>, vector<8x8xf32>,
    %38 = vector.extract_strided_slice %11 {offsets = [0, 8], sizes = [8, 8], strides = [1, 1]} : vector<8x32xf32> to vector<8x8xf32>
    %39 = arith.truncf %38 : vector<8x8xf32> to vector<8x8xbf16>
    %40 = vector.extract_strided_slice %13 {offsets = [0, 8], sizes = [8, 8], strides = [1, 1]} : vector<8x32xbf16> to vector<8x8xbf16>
    %41 = vector.extract_strided_slice %15 {offsets = [0, 8], sizes = [8, 8], strides = [1, 1]} : vector<8x32xbf16> to vector<8x8xbf16>
    %cst_16 = arith.constant dense<0.000000e+00> : vector<8x8xf32>
    %42 = tpu.matmul %39, %40, %cst_16 {dimension_numbers = #tpu.dot_dimension_numbers<[1], [1], [0], [0], [0, 0, 1, 0], [], []>} : vector<8x8xbf16>, vector<8x8xbf16>, vector<8x8xf32> -> vector<8x8xf32>
    %cst_17 = arith.constant dense<0xFF800000> : vector<8xf32>
    %43 = vector.multi_reduction <maximumf>, %42, %cst_17 [1] : vector<8x8xf32> to vector<8xf32>
    %44 = vector.shape_cast %43 : vector<8xf32> to vector<8x1xf32>
    %45 = vector.broadcast %44 : vector<8x1xf32> to vector<8x8xf32>
    %46 = arith.subf %42, %45 : vector<8x8xf32>
    %47 = math.exp %46 : vector<8x8xf32>
    %cst_18 = arith.constant dense<0.000000e+00> : vector<8xf32>
    %48 = vector.multi_reduction <add>, %47, %cst_18 [1] : vector<8x8xf32> to vector<8xf32>
    %49 = vector.shape_cast %48 : vector<8xf32> to vector<8x1xf32>
    %50 = tpu.reciprocal %49 {approx = true} : vector<8x1xf32> -> vector<8x1xf32>
    %51 = vector.broadcast %50 : vector<8x1xf32> to vector<8x8xf32>
    %52 = arith.mulf %47, %51 : vector<8x8xf32>
    %53 = arith.truncf %52 : vector<8x8xf32> to vector<8x8xbf16>
    %c0_19 = arith.constant 0 : index
    %c1 = arith.constant 1 : index
    %c0_20 = arith.constant 0 : index
    %c0_21 = arith.constant 0 : index
    %54 = vector.load %arg8[%c0_19, %c1, %c0_20, %c0_21] : memref<1x4x8x8xbf16, #tpu.memory_space<vmem>>, vector<1x1x8x8xbf16>
    %55 = vector.shape_cast %54 : vector<1x1x8x8xbf16> to vector<8x8xbf16>
    %56 = vector.shape_cast %53 : vector<8x8xbf16> to vector<1x1x8x8xbf16>
    tpu.vector_store %arg8[%c0_19, %c1, %c0_20, %c0_21], %56 {strides = array<i32>} : memref<1x4x8x8xbf16, #tpu.memory_space<vmem>>, vector<1x1x8x8xbf16>,
    %57 = arith.truncf %52 : vector<8x8xf32> to vector<8x8xbf16>
    %cst_22 = arith.constant dense<0.000000e+00> : vector<8x8xf32>
    %58 = tpu.matmul %57, %41, %cst_22 {dimension_numbers = #tpu.dot_dimension_numbers<[1], [0], [0], [1], [0, 0, 1, 1], [], []>} : vector<8x8xbf16>, vector<8x8xbf16>, vector<8x8xf32> -> vector<8x8xf32>
    %c0_23 = arith.constant 0 : index
    %c8 = arith.constant 8 : index
    %59 = vector.load %arg9[%c0_23, %c8] : memref<8x32xf32, #tpu.memory_space<vmem>>, vector<8x8xf32>
    tpu.vector_store %arg9[%c0_23, %c8], %58 {strides = array<i32>} : memref<8x32xf32, #tpu.memory_space<vmem>>, vector<8x8xf32>,
    %60 = vector.extract_strided_slice %11 {offsets = [0, 16], sizes = [8, 8], strides = [1, 1]} : vector<8x32xf32> to vector<8x8xf32>
    %61 = arith.truncf %60 : vector<8x8xf32> to vector<8x8xbf16>
    %62 = vector.extract_strided_slice %13 {offsets = [0, 16], sizes = [8, 8], strides = [1, 1]} : vector<8x32xbf16> to vector<8x8xbf16>
    %63 = vector.extract_strided_slice %15 {offsets = [0, 16], sizes = [8, 8], strides = [1, 1]} : vector<8x32xbf16> to vector<8x8xbf16>
    %cst_24 = arith.constant dense<0.000000e+00> : vector<8x8xf32>
    %64 = tpu.matmul %61, %62, %cst_24 {dimension_numbers = #tpu.dot_dimension_numbers<[1], [1], [0], [0], [0, 0, 1, 0], [], []>} : vector<8x8xbf16>, vector<8x8xbf16>, vector<8x8xf32> -> vector<8x8xf32>
    %cst_25 = arith.constant dense<0xFF800000> : vector<8xf32>
    %65 = vector.multi_reduction <maximumf>, %64, %cst_25 [1] : vector<8x8xf32> to vector<8xf32>
    %66 = vector.shape_cast %65 : vector<8xf32> to vector<8x1xf32>
    %67 = vector.broadcast %66 : vector<8x1xf32> to vector<8x8xf32>
    %68 = arith.subf %64, %67 : vector<8x8xf32>
    %69 = math.exp %68 : vector<8x8xf32>
    %cst_26 = arith.constant dense<0.000000e+00> : vector<8xf32>
    %70 = vector.multi_reduction <add>, %69, %cst_26 [1] : vector<8x8xf32> to vector<8xf32>
    %71 = vector.shape_cast %70 : vector<8xf32> to vector<8x1xf32>
    %72 = tpu.reciprocal %71 {approx = true} : vector<8x1xf32> -> vector<8x1xf32>
    %73 = vector.broadcast %72 : vector<8x1xf32> to vector<8x8xf32>
    %74 = arith.mulf %69, %73 : vector<8x8xf32>
    %75 = arith.truncf %74 : vector<8x8xf32> to vector<8x8xbf16>
    %c0_27 = arith.constant 0 : index
    %c2 = arith.constant 2 : index
    %c0_28 = arith.constant 0 : index
    %c0_29 = arith.constant 0 : index
    %76 = vector.load %arg8[%c0_27, %c2, %c0_28, %c0_29] : memref<1x4x8x8xbf16, #tpu.memory_space<vmem>>, vector<1x1x8x8xbf16>
    %77 = vector.shape_cast %76 : vector<1x1x8x8xbf16> to vector<8x8xbf16>
    %78 = vector.shape_cast %75 : vector<8x8xbf16> to vector<1x1x8x8xbf16>
    tpu.vector_store %arg8[%c0_27, %c2, %c0_28, %c0_29], %78 {strides = array<i32>} : memref<1x4x8x8xbf16, #tpu.memory_space<vmem>>, vector<1x1x8x8xbf16>,
    %79 = arith.truncf %74 : vector<8x8xf32> to vector<8x8xbf16>
    %cst_30 = arith.constant dense<0.000000e+00> : vector<8x8xf32>
    %80 = tpu.matmul %79, %63, %cst_30 {dimension_numbers = #tpu.dot_dimension_numbers<[1], [0], [0], [1], [0, 0, 1, 1], [], []>} : vector<8x8xbf16>, vector<8x8xbf16>, vector<8x8xf32> -> vector<8x8xf32>
    %c0_31 = arith.constant 0 : index
    %c16 = arith.constant 16 : index
    %81 = vector.load %arg9[%c0_31, %c16] : memref<8x32xf32, #tpu.memory_space<vmem>>, vector<8x8xf32>
    tpu.vector_store %arg9[%c0_31, %c16], %80 {strides = array<i32>} : memref<8x32xf32, #tpu.memory_space<vmem>>, vector<8x8xf32>,
    %82 = vector.extract_strided_slice %11 {offsets = [0, 24], sizes = [8, 8], strides = [1, 1]} : vector<8x32xf32> to vector<8x8xf32>
    %83 = arith.truncf %82 : vector<8x8xf32> to vector<8x8xbf16>
    %84 = vector.extract_strided_slice %13 {offsets = [0, 24], sizes = [8, 8], strides = [1, 1]} : vector<8x32xbf16> to vector<8x8xbf16>
    %85 = vector.extract_strided_slice %15 {offsets = [0, 24], sizes = [8, 8], strides = [1, 1]} : vector<8x32xbf16> to vector<8x8xbf16>
    %cst_32 = arith.constant dense<0.000000e+00> : vector<8x8xf32>
    %86 = tpu.matmul %83, %84, %cst_32 {dimension_numbers = #tpu.dot_dimension_numbers<[1], [1], [0], [0], [0, 0, 1, 0], [], []>} : vector<8x8xbf16>, vector<8x8xbf16>, vector<8x8xf32> -> vector<8x8xf32>
    %cst_33 = arith.constant dense<0xFF800000> : vector<8xf32>
    %87 = vector.multi_reduction <maximumf>, %86, %cst_33 [1] : vector<8x8xf32> to vector<8xf32>
    %88 = vector.shape_cast %87 : vector<8xf32> to vector<8x1xf32>
    %89 = vector.broadcast %88 : vector<8x1xf32> to vector<8x8xf32>
    %90 = arith.subf %86, %89 : vector<8x8xf32>
    %91 = math.exp %90 : vector<8x8xf32>
    %cst_34 = arith.constant dense<0.000000e+00> : vector<8xf32>
    %92 = vector.multi_reduction <add>, %91, %cst_34 [1] : vector<8x8xf32> to vector<8xf32>
    %93 = vector.shape_cast %92 : vector<8xf32> to vector<8x1xf32>
    %94 = tpu.reciprocal %93 {approx = true} : vector<8x1xf32> -> vector<8x1xf32>
    %95 = vector.broadcast %94 : vector<8x1xf32> to vector<8x8xf32>
    %96 = arith.mulf %91, %95 : vector<8x8xf32>
    %97 = arith.truncf %96 : vector<8x8xf32> to vector<8x8xbf16>
    %c0_35 = arith.constant 0 : index
    %c3 = arith.constant 3 : index
    %c0_36 = arith.constant 0 : index
    %c0_37 = arith.constant 0 : index
    %98 = vector.load %arg8[%c0_35, %c3, %c0_36, %c0_37] : memref<1x4x8x8xbf16, #tpu.memory_space<vmem>>, vector<1x1x8x8xbf16>
    %99 = vector.shape_cast %98 : vector<1x1x8x8xbf16> to vector<8x8xbf16>
    %100 = vector.shape_cast %97 : vector<8x8xbf16> to vector<1x1x8x8xbf16>
    tpu.vector_store %arg8[%c0_35, %c3, %c0_36, %c0_37], %100 {strides = array<i32>} : memref<1x4x8x8xbf16, #tpu.memory_space<vmem>>, vector<1x1x8x8xbf16>,
    %101 = arith.truncf %96 : vector<8x8xf32> to vector<8x8xbf16>
    %cst_38 = arith.constant dense<0.000000e+00> : vector<8x8xf32>
    %102 = tpu.matmul %101, %85, %cst_38 {dimension_numbers = #tpu.dot_dimension_numbers<[1], [0], [0], [1], [0, 0, 1, 1], [], []>} : vector<8x8xbf16>, vector<8x8xbf16>, vector<8x8xf32> -> vector<8x8xf32>
    %c0_39 = arith.constant 0 : index
    %c24 = arith.constant 24 : index
    %103 = vector.load %arg9[%c0_39, %c24] : memref<8x32xf32, #tpu.memory_space<vmem>>, vector<8x8xf32>
    tpu.vector_store %arg9[%c0_39, %c24], %102 {strides = array<i32>} : memref<8x32xf32, #tpu.memory_space<vmem>>, vector<8x8xf32>,
    %c0_i32 = arith.constant 0 : i32
    %104 = arith.cmpi eq, %arg1, %c0_i32 : i32
    %105 = arith.extui %104 : i1 to i32
    %c0_i32_40 = arith.constant 0 : i32
    %106 = arith.cmpi ne, %105, %c0_i32_40 : i32
    scf.if %106 {
      %c0_52 = arith.constant 0 : index
      %c0_53 = arith.constant 0 : index
      %119 = vector.load %arg6[%c0_52, %c0_53] : memref<1x32xf32, #tpu.memory_space<vmem>>, vector<1x32xf32>
      %120 = vector.shape_cast %119 : vector<1x32xf32> to vector<1x32xf32>
      %121 = vector.broadcast %120 : vector<1x32xf32> to vector<8x32xf32>
      %c0_54 = arith.constant 0 : index
      %c0_55 = arith.constant 0 : index
      %c0_56 = arith.constant 0 : index
      %122 = vector.load %arg7[%c0_54, %c0_55, %c0_56] : memref<1x8x32xf32, #tpu.memory_space<vmem>>, vector<1x8x32xf32>
      %123 = vector.shape_cast %122 : vector<1x8x32xf32> to vector<8x32xf32>
      %124 = vector.shape_cast %121 : vector<8x32xf32> to vector<1x8x32xf32>
      tpu.vector_store %arg7[%c0_54, %c0_55, %c0_56], %124 {strides = array<i32>} : memref<1x8x32xf32, #tpu.memory_space<vmem>>, vector<1x8x32xf32>,
    } else {
    }
    %c0_41 = arith.constant 0 : index
    %c0_42 = arith.constant 0 : index
    %c0_43 = arith.constant 0 : index
    %107 = vector.load %arg7[%c0_41, %c0_42, %c0_43] : memref<1x8x32xf32, #tpu.memory_space<vmem>>, vector<1x8x32xf32>
    %108 = vector.shape_cast %107 : vector<1x8x32xf32> to vector<8x32xf32>
    %c0_44 = arith.constant 0 : index
    %c0_45 = arith.constant 0 : index
    %109 = vector.load %arg9[%c0_44, %c0_45] : memref<8x32xf32, #tpu.memory_space<vmem>>, vector<8x32xf32>
    %110 = arith.truncf %109 : vector<8x32xf32> to vector<8x32xbf16>
    %111 = arith.index_cast %arg1 : i32 to index
    %c0_46 = arith.constant 0 : index
    %c0_47 = arith.constant 0 : index
    %112 = vector.load %arg5[%111, %c0_46, %c0_47] : memref<1x32x32xbf16, #tpu.memory_space<vmem>>, vector<1x32x32xbf16>
    %113 = vector.shape_cast %112 : vector<1x32x32xbf16> to vector<32x32xbf16>
    %cst_48 = arith.constant dense<0.000000e+00> : vector<8x32xf32>
    %114 = tpu.matmul %110, %113, %cst_48 {dimension_numbers = #tpu.dot_dimension_numbers<[1], [0], [0], [1], [0, 0, 1, 1], [], []>} : vector<8x32xbf16>, vector<32x32xbf16>, vector<8x32xf32> -> vector<8x32xf32>
    %115 = arith.addf %108, %114 : vector<8x32xf32>
    %c0_49 = arith.constant 0 : index
    %c0_50 = arith.constant 0 : index
    %c0_51 = arith.constant 0 : index
    %116 = vector.load %arg7[%c0_49, %c0_50, %c0_51] : memref<1x8x32xf32, #tpu.memory_space<vmem>>, vector<1x8x32xf32>
    %117 = vector.shape_cast %116 : vector<1x8x32xf32> to vector<8x32xf32>
    %118 = vector.shape_cast %115 : vector<8x32xf32> to vector<1x8x32xf32>
    tpu.vector_store %arg7[%c0_49, %c0_50, %c0_51], %118 {strides = array<i32>} : memref<1x8x32xf32, #tpu.memory_space<vmem>>, vector<1x8x32xf32>,
    return
  }
  func.func @transform_0(%arg0: i32, %arg1: i32) -> (i32, i32, i32) {
    %c0_i32 = arith.constant 0 : i32
    %c0_i32_0 = arith.constant 0 : i32
    %c0_i32_1 = arith.constant 0 : i32
    return %arg0, %c0_i32, %c0_i32_0 : i32, i32, i32
  }
  func.func @transform_1(%arg0: i32, %arg1: i32) -> (i32, i32, i32) {
    %c0_i32 = arith.constant 0 : i32
    %c0_i32_0 = arith.constant 0 : i32
    %c0_i32_1 = arith.constant 0 : i32
    %c0_i32_2 = arith.constant 0 : i32
    return %c0_i32, %c0_i32_0, %c0_i32_1 : i32, i32, i32
  }
  func.func @transform_2(%arg0: i32, %arg1: i32) -> (i32, i32, i32) {
    %c0_i32 = arith.constant 0 : i32
    %c0_i32_0 = arith.constant 0 : i32
    %c0_i32_1 = arith.constant 0 : i32
    %c0_i32_2 = arith.constant 0 : i32
    return %c0_i32, %c0_i32_0, %c0_i32_1 : i32, i32, i32
  }
  func.func @transform_3(%arg0: i32, %arg1: i32) -> (i32, i32, i32) {
    %c0_i32 = arith.constant 0 : i32
    %c0_i32_0 = arith.constant 0 : i32
    %c0_i32_1 = arith.constant 0 : i32
    %c0_i32_2 = arith.constant 0 : i32
    return %c0_i32, %c0_i32_0, %c0_i32_1 : i32, i32, i32
  }
  func.func @transform_4(%arg0: i32, %arg1: i32) -> (i32, i32) {
    %c0_i32 = arith.constant 0 : i32
    %c0_i32_0 = arith.constant 0 : i32
    %c0_i32_1 = arith.constant 0 : i32
    return %c0_i32, %c0_i32_0 : i32, i32
  }
  func.func @transform_5(%arg0: i32, %arg1: i32) -> (i32, i32, i32) {
    %c0_i32 = arith.constant 0 : i32
    %c0_i32_0 = arith.constant 0 : i32
    %c0_i32_1 = arith.constant 0 : i32
    return %arg0, %c0_i32, %c0_i32_0 : i32, i32, i32
  }
  func.func @transform_6(%arg0: i32, %arg1: i32) -> (i32, i32, i32, i32) {
    %c0_i32 = arith.constant 0 : i32
    %c0_i32_0 = arith.constant 0 : i32
    %c0_i32_1 = arith.constant 0 : i32
    return %arg0, %arg1, %c0_i32, %c0_i32_0 : i32, i32, i32, i32
  }
}

</mosaic_0001>

<bundles_post_ra>
// kernel: tpu_custom_call.1
= control target key start
LH: loop header
LB: loop body
LE: loop exit
PB: predicated region body
PF: predicated region fallthrough
CT: control target
= control target key end

     0   :  { %s1520_s0 = inlined_call_operand.hbm [shape: bf16[2,8,32], index: 0, kind: input, shape index: {}]   ;;  %s1521_s1 = inlined_call_operand.hbm [shape: bf16[1,32,96], index: 1, kind: input, shape index: {}]   ;;  %s1522_s2 = inlined_call_operand.vmem [shape: f32[1,1,96], index: 2, kind: input, shape index: {}]   ;;  %s1523_s3 = inlined_call_operand.hbm [shape: bf16[1,32,32], index: 3, kind: input, shape index: {}]   ;;  %s1524_s4 = inlined_call_operand.vmem [shape: f32[1,32], index: 4, kind: input, shape index: {}]   ;;  %s1525_s5 = inlined_call_operand.hbm [shape: f32[2,8,32], index: 5, kind: output, shape index: {0}]   ;;  %s1526_s6 = inlined_call_operand.hbm [shape: bf16[2,4,8,8], index: 6, kind: output, shape index: {1}]  }
   0x1   :  { %1528 = sst [smem:[#allocation16_spill]] %s1520_s0 }
   0x2   :  { %1529 = sst [smem:[#allocation17_spill]] %s1521_s1 }
   0x3   :  { %12 = vsyncpa [#allocation4], 0 }
   0x4   :  { %14 = vsyncpa [#allocation4 + $0x1], 0 }
   0x5   :  { %15 = vsyncpa [#allocation7], 0 }
   0x6   :  { %16 = vsyncpa [#allocation5], 0 }
   0x7   :  { %18 = vsyncpa [#allocation5 + $0x1], 0 }
   0x8   :  { %19 = vsyncpa [#allocation11], 0 }
   0x9   :  { %21 = vsyncpa [#allocation11 + $0x1], 0  ;;  %s1294_s21 = smov 0   ;;  %s1296_s22 = smov 0  }
   0xa   :  { %s1298_s23 = smov 0   ;;  %s1300_s24 = smov 0  }
   0xb   :  { %s1302_s25 = smov 0   ;;  %s1304_s26 = smov 0  }
   0xc LB: > { %s852_s27 = sadd.s32 4294967295, %s1238_s26   ;;  %p854_p0 = scmp.ge.s32.totalorder %s1238_s26, 1  ;;  %s1238_s26 = sphi %s1304_s26, %s27_s26   ;;  %s1234_s25 = sphi %s1302_s25, %s1542_s25   ;;  %s1230_s24 = sphi %s1300_s24, %s1541_s24   ;;  %s1226_s23 = sphi %s1298_s23, %s1540_s23   ;;  %s1222_s22 = sphi %s1296_s22, %s1539_s22   ;;  %s1218_s21 = sphi %s1294_s21, %s1538_s21  }
   0xd   : > { %p1328_p1 = scmp.eq.s32.totalorder %s852_s27, 0  ;;  %p208_p2 = scmp.lt.s32.totalorder %s1238_s26, 3 }
   0xe   : > { %s1531_s1 = sld [smem:[#allocation17_spill]]  ;;  %s1240_s9 = smov [#allocation6]  }
   0xf   : > { %p1336_p3 = pnand %p854_p0, %p208_p2  ;;  %s221_s10 = sshll.u32 %s1240_s9, 4  ;;  %s222_s10 = int_to_ptr.vmem [resolvable:$true] %s221_s10 }
  0x10   : > { %p857_p6 = scmp.ge.s32.totalorder %s1238_s26, 2  ;;  %s236_s13 = sshll.u32 %s1523_s3, 4  ;;  %s237_s13 = int_to_ptr.hbm [resolvable:$true] %s236_s13 }
  0x11   : > { %p921_p4 = pneg %p1336_p3  ;;  %s1241_s14 = smov 64  }
  0x12   : > { %s1242_s15 = smov 4   ;;  %s1243_s16 = smov [#allocation8]  }
  0x13   : > { %p922_p5 = pnand %p921_p4, %p1328_p1  ;;  %s238_s17 = sshll.u32 %s1243_s16, 4  ;;  %s239_s17 = int_to_ptr.vmem [resolvable:$true] %s238_s17 }
  0x14   : > { %s219_s7 = sshll.u32 %s1531_s1, 4  ;;  %s39_s18 = sadd.s32 1, %s1234_s25  ;;  %s220_s7 = int_to_ptr.hbm [resolvable:$true] %s219_s7 }
  0x15   : > { %924 = dma.hbm_to_vmem [thread:$0]  (!%p922_p5), %s220_s7, 256, %s222_s10, [#allocation7], %s1241_s14, %s1241_s14, %s1242_s15  }
  0x16   : > { %927 = dma.hbm_to_vmem [thread:$0]  (!%p922_p5), %s237_s13, 256, %s239_s17, [#allocation7], %s1241_s14, %s1241_s14, %s1242_s15  }
  0x17   : > { %s853_s19 = sadd.s32 4294967294, %s1238_s26   ;;  %p41_p7 = scmp.ge.s32.totalorder %s39_s18, 2 }
  0x18   : > { %s46_s20 = sadd.s32 1, %s1226_s23  ;;  %p53_p8 = scmp.ne.s32.totalorder %s1226_s23, %s1222_s22 }
  0x19   : > { %s1544_s18 = smov (%p41_p7, %s39_s18), 0  ;;  %p54_p9 = scmp.eq.s32.totalorder %s1238_s26, 0 }
  0x1a   : > { %p59_p10 = scmp.ne.s32.totalorder %s1222_s22, %s1218_s21  ;;  %s43_s29 = ssub.s32 %s1234_s25, %s1544_s18 }
  0x1b   : > { %p167_p11 = scmp.eq.s32.totalorder %s852_s27, 1  ;;  %p44_p12 = scmp.eq.s32.totalorder %s43_s29, 0 }
  0x1c   : > { %p1364_p13 = por %p1328_p1, %p59_p10  ;;  %p173_p2 = scmp.eq.s32.totalorder %s853_s19, 1 }
  0x1d   : > { %p1368_p0 = por %p167_p11, %p53_p8  ;;  %p55_p4 = por %p54_p9, %p53_p8 }
  0x1e   : > { %s1373_s9 = scalar_select %p44_p12, %s1226_s23, %s46_s20  }
  0x1f   : > { %p1375_p5 = por %p173_p2, %p59_p10  ;;  %s255_s11 = sand.u32 1, %s1226_s23  }
  0x20   : > { %s859_s27 = sshll.u32 %s1234_s25, 2  ;;  %p941_p7 = scmp.lt.s32.totalorder %s1238_s26, 2 }
  0x21   : > { %s858_s12 = sshll.u32 %s255_s11, 2  ;;  %s1536_s0 = sld [smem:[#allocation16_spill]] }
  0x22   : > { %s259_s17 = scalar_lea.vmem [#allocation3], %s858_s12  ;;  %p929_p11 = pnand %p941_p7, %p55_p4 }
  0x23   : > { %s267_s29 = sshll.u32 %s259_s17, 4  ;;  %s256_s19 = scalar_lea.sflag [#allocation4], %s255_s11  ;;  %s268_s29 = int_to_ptr.vmem [resolvable:$true] %s267_s29 }
  0x24   : > { %s1388_s20 = sand.u32 (!%p1336_p3), 1, %s1222_s22  }
  0x25   : > { %276 = sbr.rel (%p1336_p3) target bundleno = 1129 (0x469), region = 40  ;;  %s861_s1 = sshll.u32 (!%p1336_p3), %s1388_s20, 2 }
  0x26   : > { %s279_s13 = scalar_lea.sflag (!%p1336_p3), [#allocation4], %s1388_s20 }
  0x27   : > { %s263_s15 = scalar_lea.hbm %s1536_s0, %s859_s27  ;;  %s282_s27 = scalar_lea.vmem (!%p1336_p3), [#allocation3], %s861_s1 }
  0x28   : > { %s265_s16 = sshll.u32 %s263_s15, 4  ;;  %s266_s16 = int_to_ptr.hbm [resolvable:$true] %s265_s16 }
  0x29   : > { %931 = dma.hbm_to_vmem [thread:$0]  (!%p929_p11), %s266_s16, 64, %s268_s29, %s256_s19  }
  0x2a   : > { %1201 = dma.done.wait (%p1364_p13), %s279_s13, 64  }
  0x2b   : > { %1203 = vsyncadd (%p1364_p13), %s279_s13, 4294967232 }
  0x2c   : > { %1205 = dma.done.wait (%p1328_p1), [#allocation7], 512  }
  0x2d   : > { %1207 = vsyncadd (%p1328_p1), [#allocation7], 4294966784  ;;  %v903_v0 = vld [vmem:[#allocation6 + $0x8] sm:$0xff]  ;;  %v902_v1 = vld [vmem:[#allocation6] sm:$0xff]  ;;  %vm354_vm0 = vcmask 261120   ;;  %s1244_s30 = smov 104  }
  0x2e   : > { %364 = vmatpush.bf16.msra.mxu0 %v903_v0  ;;  %v329_v2 = vld [vmem:[%s282_s27] sm:$0xf]  ;;  %v1012_v3 = vld [vmem:[%s1522_s2] ss:$0 sm:$0xff]  ;;  %s1245_s28 = smov 120   ;;  %s1246_s11 = smov 96  }
  0x2f   : > { %s1247_s12 = smov 80   ;;  %s1248_s14 = smov 72   ;;  %vm377_vm1 = vcmask 64512   ;;  %vm416_vm2 = vcmask 1043456   ;;  %vm409_vm3 = vcmask 60416   ;;  %vm496_vm4 = vcmask 130112  }
  0x30   : > { %s1249_s15 = smov 88   ;;  %s1250_s16 = smov 112   ;;  %vm560_vm5 = vcmask 195712   ;;  %vm624_vm6 = vcmask 261312  }
  0x31   : > { %s1527_s17 = smov 64   ;;  %s1252_s29 = smov 40  }
  0x32   : > { %365 = vmatpush.bf16.msra.mxu0 %v902_v1  ;;  %s1253_s19 = smov 56   ;;  %s1254_s13 = smov 48  }
  0x33   : > { %s865_s27 = sshll.u32 %s1388_s20, 4  ;;  %s1255_s8 = smov 8  }
  0x34   : > { %s1433_s1 = scalar_lea.vmem [#allocation10], %s865_s27 }
  0x35   : > { %874 = vmatmul.msk.bf16.vlgmr.msra.gmra.mxu0 %vm354_vm0, %v329_v2 }
  0xb2   : > { %v367_v4 = vpop.f32.mrf.mxu0 }
  0xb3   : > { %v368_v5 = vadd.f32 %v1012_v3, %v367_v4 }
  0xb5   : > { %v371_v6 = vpack.c.bf16 %v368_v5, %v368_v5 }
  0xb7   : > { %v373_v7 = vunpack.c.l.b16 %v371_v6  ;;  %562 = vrot.lane.b32.xlu2 %v371_v6, %s1244_s30  ;;  %434 = vrot.lane.b32.xlu1 %v371_v6, %s1245_s28  ;;  %s1256_s30 = smov 16   ;;  %s1257_s28 = smov 24  }
  0xb9   : > { %v1404_v8 = vpack.c.b16 %v373_v7, %v373_v7 }
  0xba   : > { %v369_v9 = vpop.f32.mrf.mxu0 }
  0xbb   : > { %375 = vrot.lane.b32.xlu0 %v1404_v8, %s1246_s11  ;;  %s864_s11 = sshll.u32 %s1388_s20, 3 }
  0xbf   : > { %500 = vrot.lane.b32.xlu2 %v1404_v8, %s1247_s12  ;;  %564 = vrot.lane.b32.xlu1 %v1404_v8, %s1248_s14 }
  0xc3   : > { %436 = vrot.lane.b32.xlu0 %v1404_v8, %s1249_s15  ;;  %s1455_s15 = scalar_lea.vmem [#allocation9], %s864_s11 }
  0xcb   : > { %498 = vrot.lane.b32.xlu0 %v371_v6, %s1250_s16  ;;  %s906_s16 = sshll.u32 %s1230_s24, 4 }
  0xcc   : > { %s707_s27 = scalar_lea.hbm %s1526_s6, %s906_s16 }
 0x111   : > { %v563_v10 = vpop.permute.xlu2 %562 }
 0x119   : > { %v501_v11 = vpop.permute.xlu2 %500 }
 0x11a   : > { %v506_v12 = vsel %vm377_vm1, %v501_v11, 0 }
 0x11b   : > { %515 = vmatpush.bf16.xpose.msrb.mxu0 %v506_v12 }
 0x129   : > { %v435_v13 = vpop.permute.xlu1 %434 }
 0x12d   : > { %v376_v14 = vpop.permute.xlu0 %375 }
 0x12e   : > { %v382_v15 = vsel %vm377_vm1, %v376_v14, 0 }
 0x12f   : > { %391 = vmatpush.bf16.xpose.msra.mxu1 %v382_v15 }
 0x131   : > { %v565_v16 = vpop.permute.xlu1 %564 }
 0x132   : > { %v570_v19 = vsel %vm377_vm1, %v565_v16, 0 }
 0x135   : > { %v437_v17 = vpop.permute.xlu0 %436 }
 0x136   : > { %875 = vmatmul.msk.bf16.vlgmr.msra.gmra.mxu1 %vm377_vm1, %v371_v6  ;;  %v442_v18 = vsel %vm377_vm1, %v437_v17, 0 }
 0x137   : > { %451 = vmatpush.bf16.xpose.msra.mxu3 %v442_v18 }
 0x13d   : > { %v499_v20 = vpop.permute.xlu0 %498 }
 0x13e   : > { %877 = vmatmul.msk.bf16.vlgmr.msra.gmra.mxu3 %vm377_vm1, %v435_v13  ;;  %880 = vmatmul.msk.bf16.vlgmr.msrb.gmra.mxu0 %vm377_vm1, %v499_v20 }
 0x13f   : > { %579 = vmatpush.bf16.xpose.msrb.mxu3 %v570_v19 }
 0x14e   : > { %883 = vmatmul.msk.bf16.vlgmr.msrb.gmra.mxu3 %vm377_vm1, %v563_v10 }
 0x1b3   : > { %v393_v21 = vpop.f32.mrf.mxu1 }
 0x1b4   : > { %v397_v22 = vsel %vm377_vm1, %v393_v21, -inf }
 0x1b5   : > { %398 = vmax.xlane.f32.xlu1 %v397_v22  ;;  %v904_v22 = vld [vmem:[#allocation8] sm:$0xff] }
 0x1bb   : > { %v395_v23 = vpop.f32.mrf.mxu1  ;;  %v517_v24 = vpop.f32.mrf.mxu0 }
 0x1bc   : > { %v521_v29 = vsel %vm377_vm1, %v517_v24, -inf  ;;  %v1013_v23 = vld [vmem:[%s1524_s4] ss:$0 sm:$0xff] }
 0x1bd   : > { %634 = vst.msk [vmem:[%s1455_s15] sm:$0xff] %vm354_vm0, %v1013_v23 }
 0x1c1   : > { %v453_v25 = vpop.f32.mrf.mxu3 }
 0x1c2   : > { %v457_v26 = vsel %vm377_vm1, %v453_v25, -inf }
 0x1c3   : > { %458 = vmax.xlane.f32.xlu2 %v457_v26  ;;  %v519_v27 = vpop.f32.mrf.mxu0 }
 0x1c9   : > { %v455_v28 = vpop.f32.mrf.mxu3 }
 0x1cb   : > { %522 = vmax.xlane.f32.xlu2 %v521_v29 }
 0x1d1   : > { %v581_v30 = vpop.f32.mrf.mxu3 }
 0x1d2   : > { %v585_v31 = vsel %vm377_vm1, %v581_v30, -inf }
 0x1d3   : > { %586 = vmax.xlane.f32.xlu0 %v585_v31 }
 0x1d9   : > { %v583_v32 = vpop.f32.mrf.mxu3 }
 0x1e3   : > { %411 = vrot.lane.b32.xlu2 %v1404_v8, %s1527_s17  ;;  %s1140_s17 = scalar_lea.hbm %s1526_s6, 32 }
 0x1eb   : > { %599 = vrot.lane.b32.xlu2 %v1404_v8, %s1252_s29  ;;  %s708_s29 = sshll.u32 %s1433_s1, 4  ;;  %s709_s29 = int_to_ptr.vmem [resolvable:$true] %s708_s29 }
 0x228   : > { %v399_v33 = vpop.xlane.xlu1 %398 }
 0x229   : > { %v400_v34 = vsub.f32 %v393_v21, %v399_v33  ;;  %v905_v21 = vld [vmem:[#allocation8 + $0x8] sm:$0xff] }
 0x22a   : > { %665 = vmatpush.bf16.msra.mxu0 %v905_v21 }
 0x22b   : > { %v401_v35 = vmul.f32 1.442695, %v400_v34 }
 0x22d   : > { %1014 = vpow2.f32 %v401_v35 }
 0x22e   : > { %666 = vmatpush.bf16.msra.mxu0 %v904_v22 }
 0x233   : > { %v1015_v36 = vpop.eup %1014 }
 0x234   : > { %v403_v37 = vsel %vm377_vm1, %v1015_v36, 0.0 }
 0x235   : > { %404 = vadd.xlane.f32.xlu1 %v403_v37 }
 0x236   : > { %v459_v38 = vpop.xlane.xlu2 %458 }
 0x237   : > { %v460_v41 = vsub.f32 %v453_v25, %v459_v38 }
 0x239   : > { %v461_v43 = vmul.f32 1.442695, %v460_v41 }
 0x23e   : > { %v523_v39 = vpop.xlane.xlu2 %522 }
 0x23f   : > { %v524_v40 = vsub.f32 %v517_v24, %v523_v39 }
 0x241   : > { %v525_v42 = vmul.f32 1.442695, %v524_v40 }
 0x243   : > { %1016 = vpow2.f32 %v525_v42 }
 0x244   : > { %1018 = vpow2.f32 %v461_v43 }
 0x246   : > { %v412_v44 = vpop.permute.xlu2 %411  ;;  %v587_v45 = vpop.xlane.xlu0 %586 }
 0x247   : > { %v418_v46 = vsel %vm416_vm2, %v412_v44, 0  ;;  %v588_v48 = vsub.f32 %v581_v30, %v587_v45 }
 0x248   : > { %427 = vmatpush.bf16.msra.mxu2 %v418_v46 }
 0x249   : > { %v1017_v47 = vpop.eup %1016  ;;  %v589_v50 = vmul.f32 1.442695, %v588_v48 }
 0x24a   : > { %v527_v49 = vsel %vm377_vm1, %v1017_v47, 0.0  ;;  %v1019_v51 = vpop.eup %1018 }
 0x24b   : > { %528 = vadd.xlane.f32.xlu0 %v527_v49  ;;  %1020 = vpow2.f32 %v589_v50  ;;  %v463_v52 = vsel %vm377_vm1, %v1019_v51, 0.0 }
 0x24e   : > { %471 = vrot.lane.b32.xlu1 %v1404_v8, %s1253_s19  ;;  %v600_v60 = vpop.permute.xlu2 %599 }
 0x24f   : > { %v605_v63 = vsel %vm416_vm2, %v600_v60, 0 }
 0x251   : > { %v1021_v53 = vpop.eup %1020 }
 0x252   : > { %v591_v54 = vsel %vm377_vm1, %v1021_v53, 0.0 }
 0x253   : > { %464 = vadd.xlane.f32.xlu0 %v463_v52 }
 0x25b   : > { %592 = vadd.xlane.f32.xlu0 %v591_v54 }
 0x26f   : > { %535 = vrot.lane.b32.xlu0 %v1404_v8, %s1254_s13 }
 0x2a8   : > { %v405_v55 = vpop.xlane.xlu1 %404 }
 0x2a9   : > { %1022 = vrcp.f32 %v405_v55 }
 0x2af   : > { %v1023_v56 = vpop.eup %1022 }
 0x2b0   : > { %v407_v57 = vmul.f32 %v1023_v56, %v1015_v36 }
 0x2b2   : > { %v408_v58 = vpack.c.bf16 %v407_v57, %v407_v57 }
 0x2b4   : > { %410 = vst.msk [vmem:[%s1433_s1] sm:$0xf] %vm409_vm3, %v408_v58  ;;  %876 = vmatmul.msk.bf16.vlgmr.msra.gmra.mxu2 %vm377_vm1, %v408_v58 }
 0x2be   : > { %v529_v59 = vpop.xlane.xlu0 %528 }
 0x2bf   : > { %1024 = vrcp.f32 %v529_v59 }
 0x2c0   : > { %v472_v61 = vpop.permute.xlu1 %471 }
 0x2c1   : > { %v477_v62 = vsel %vm416_vm2, %v472_v61, 0 }
 0x2c2   : > { %486 = vmatpush.bf16.msrb.mxu2 %v477_v62 }
 0x2c5   : > { %v1025_v0 = vpop.eup %1024 }
 0x2c6   : > { %614 = vmatpush.bf16.msra.mxu2 %v605_v63  ;;  %v531_v1 = vmul.f32 %v1025_v0, %v1017_v47  ;;  %v465_v2 = vpop.xlane.xlu0 %464 }
 0x2c7   : > { %1026 = vrcp.f32 %v465_v2 }
 0x2c8   : > { %v532_v3 = vpack.c.bf16 %v531_v1, %v531_v1 }
 0x2ca   : > { %881 = vst.msk [vmem:[%s1433_s1 + $0x8] sm:$0xf] %vm409_vm3, %v532_v3 }
 0x2cd   : > { %v1027_v4 = vpop.eup %1026 }
 0x2ce   : > { %v467_v5 = vmul.f32 %v1027_v4, %v1019_v51  ;;  %v593_v6 = vpop.xlane.xlu0 %592 }
 0x2cf   : > { %1028 = vrcp.f32 %v593_v6 }
 0x2d0   : > { %v468_v7 = vpack.c.bf16 %v467_v5, %v467_v5 }
 0x2d2   : > { %878 = vst.msk [vmem:[%s1433_s1 + $0x4] sm:$0xf] %vm409_vm3, %v468_v7  ;;  %879 = vmatmul.msk.bf16.vlgmr.msrb.gmra.mxu2 %vm377_vm1, %v468_v7 }
 0x2d5   : > { %v1029_v8 = vpop.eup %1028 }
 0x2d6   : > { %v595_v9 = vmul.f32 %v1029_v8, %v1021_v53 }
 0x2d8   : > { %v596_v10 = vpack.c.bf16 %v595_v9, %v595_v9 }
 0x2da   : > { %884 = vst.msk [vmem:[%s1433_s1 + $0xc] sm:$0xf] %vm409_vm3, %v596_v10 }
 0x2e1   : > { %v536_v11 = vpop.permute.xlu0 %535 }
 0x2e2   : > { %885 = vmatmul.msk.bf16.vlgmr.msra.gmra.mxu2 %vm377_vm1, %v596_v10  ;;  %v541_v12 = vsel %vm416_vm2, %v536_v11, 0 }
 0x2e3   : > { %550 = vmatpush.bf16.msrb.mxu1 %v541_v12 }
 0x2e6   : > { %882 = vmatmul.msk.bf16.vlgmr.msrb.gmra.mxu1 %vm377_vm1, %v532_v3 }
 0x337   : > { %v429_v13 = vpop.f32.mrf.mxu2 }
 0x338   : > { %433 = vst.msk [vmem:[#allocation2] sm:$0xff] %vm377_vm1, %v429_v13 }
 0x33f   : > { %v431_v14 = vpop.f32.mrf.mxu2 }
 0x355   : > { %v488_v15 = vpop.f32.mrf.mxu2 }
 0x356   : > { %493 = vrot.lane.b32.xlu1 %v488_v15, %s1255_s8  ;;  %s710_s8 = sshll.u32 %s707_s27, 4  ;;  %s711_s8 = int_to_ptr.hbm [resolvable:$true] %s710_s8 }
 0x35d   : > { %v490_v16 = vpop.f32.mrf.mxu2 }
 0x363   : > { %v552_v17 = vpop.f32.mrf.mxu1 }
 0x364   : > { %557 = vrot.lane.b32.xlu2 %v552_v17, %s1256_s30  ;;  %s680_s30 = scalar_lea.sflag [#allocation11], %s1388_s20 }
 0x365   : > { %v616_v18 = vpop.f32.mrf.mxu2 }
 0x366   : > { %621 = vrot.lane.b32.xlu1 %v616_v18, %s1257_s28  ;;  %s1134_s28 = sshra.s32 %s711_s8, 4  ;;  %s1135_s28 = int_to_ptr.hbm [resolvable:$true] %s1134_s28 }
 0x367   : > { %s1136_s11 = scalar_lea.hbm %s1135_s28, 16  ;;  %p1141_p9 = scmp.lt.s32.totalorder %s1135_s28, %s1526_s6 }
 0x368   : > { %p1137_p1 = scmp.ne.s32.totalorder %s1135_s28, %s1136_s11  ;;  %p1142_p10 = scmp.lt.s32.totalorder %s1140_s17, %s1136_s11 }
 0x36a   : > { %p1138_p3 = pnand %p1137_p1, %p1368_p0  ;;  %p1143_p12 = por %p1142_p10, %p1141_p9 }
 0x36b   : > { %v554_v19 = vpop.f32.mrf.mxu1 }
 0x36c   : > { %p1139_p8 = pneg %p1138_p3 }
 0x36d   : > { %v618_v20 = vpop.f32.mrf.mxu2 }
 0x36e   : > { %p1144_p13 = pnand %p1143_p12, %p1139_p8 }
 0x3be   : > { %v558_v25 = vpop.permute.xlu2 %557 }
 0x3c8   : > { %v494_v24 = vpop.permute.xlu1 %493 }
 0x3c9   : > { %497 = vst.msk [vmem:[#allocation2] sm:$0xff] %vm496_vm4, %v494_v24 }
 0x3ca   : > { %561 = vst.msk [vmem:[#allocation2] sm:$0xff] %vm560_vm5, %v558_v25 }
 0x3d8   : > { %v622_v26 = vpop.permute.xlu1 %621 }
 0x3d9   : > { %625 = vst.msk [vmem:[#allocation2] sm:$0xff] %vm624_vm6, %v622_v26 }
 0x3e0   : > { %v636_v27 = vld [vmem:[#allocation2] sm:$0xff] }
 0x3e1   : > { %v637_v28 = vpack.c.bf16 %v636_v27, %v636_v27 }
 0x3e3   : > { %894 = vmatmul.msk.bf16.vlgmr.msra.gmra.mxu0 %vm354_vm0, %v637_v28 }
 0x3e4   : > { %1147 = shalt.err (!%p1144_p13)
}
 0x3e5   : > { %s1258_s16 = smov 4   ;;  %s1537_s19 = smov 64   ;;  %v635_v29 = vld [vmem:[%s1455_s15] sm:$0xff] }
 0x3e6   : > { %918 = dma.vmem_to_hbm [thread:$0]  (%p1368_p0), %s709_s29, 256, %s711_s8, %s680_s30, %s1537_s19, %s1537_s19, %s1258_s16  }
 0x3e7   : > { %s897_s13 = sshll.u32 %s1230_s24, 3  ;;  %s692_s28 = sshll.u32 %s1455_s15, 4  ;;  %s693_s28 = int_to_ptr.vmem [resolvable:$true] %s692_s28 }
 0x3e8   : > { %s690_s17 = scalar_lea.hbm %s1525_s5, %s897_s13  ;;  %s675_s12 = scalar_lea.sflag [#allocation5], %s1388_s20 }
 0x3e9   : > { %s694_s11 = sshll.u32 %s690_s17, 4  ;;  %s1168_s8 = scalar_lea.hbm %s1525_s5, 16  ;;  %s695_s11 = int_to_ptr.hbm [resolvable:$true] %s694_s11 }
 0x3ea   : > { %s1162_s14 = sshra.s32 %s695_s11, 4  ;;  %s1163_s14 = int_to_ptr.hbm [resolvable:$true] %s1162_s14 }
 0x3eb   : > { %s1164_s1 = scalar_lea.hbm %s1163_s14, 8  ;;  %p1169_p11 = scmp.lt.s32.totalorder %s1163_s14, %s1525_s5 }
 0x3ec   : > { %p1165_p2 = scmp.ne.s32.totalorder %s1163_s14, %s1164_s1  ;;  %p1170_p1 = scmp.lt.s32.totalorder %s1168_s8, %s1164_s1 }
 0x3ee   : > { %p1166_p4 = pnand %p1165_p2, %p1368_p0  ;;  %p1171_p3 = por %p1170_p1, %p1169_p11 }
 0x3f0   : > { %p1167_p7 = pneg %p1166_p4 }
 0x3f2   : > { %p1172_p8 = pnand %p1171_p3, %p1167_p7 }
 0x460   : > { %v668_v30 = vpop.f32.mrf.mxu0 }
 0x461   : > { %v672_v31 = vadd.f32 %v668_v30, %v635_v29 }
 0x463   : > { %673 = vst.msk [vmem:[%s1455_s15] sm:$0xff] %vm354_vm0, %v672_v31 }
 0x464   : > { %1175 = shalt.err (!%p1172_p8)
}
 0x465   : > { %917 = dma.vmem_to_hbm [thread:$0]  (%p1368_p0), %s693_s28, 128, %s695_s11, %s675_s12  }
 0x468   : > { %v670_v32 = vpop.f32.mrf.mxu0 }
 0x469 PF: > { %s725_s20 = sand.u32 1, %s1218_s21   ;;  %p933_p9 = pnand %p857_p6, %p1375_p5 }
 0x46a   : > { %s726_s15 = scalar_lea.sflag [#allocation5], %s725_s20 }
 0x46b   : > { %p934_p10 = pneg %p933_p9 }
 0x46d   : > { %1209 = dma.done.wait (%p934_p10), %s726_s15, 128  }
 0x46e   : > { %1211 = vsyncadd (%p934_p10), %s726_s15, 4294967168  ;;  %s736_s19 = scalar_lea.sflag [#allocation11], %s725_s20 }
 0x46f   : > { %1213 = dma.done.wait (%p934_p10), %s736_s19, 256  }
 0x470   : > { %1215 = vsyncadd (%p934_p10), %s736_s19, 4294967040  ;;  %s27_s26 = sadd.s32 1, %s1238_s26   ;;  %s1538_s21 = smov %s1222_s22 }
 0x471   : > { %p24_p12 = scmp.ge.s32.totalorder %s27_s26, 4   ;;  %s1539_s22 = smov %s1226_s23 }
 0x472   : > { %s1540_s23 = smov %s1373_s9  ;;  %s1541_s24 = smov %s1234_s25 }
 0x473   : > { %s1542_s25 = smov %s1544_s18  ;;  %26 = sbr.rel (!%p24_p12) target bundleno = 12 (0xc), region = 120 }
 0x478   :  { %742 = vsyncpa [#allocation4], 1 }
 0x479   :  { %744 = vsyncpa [#allocation4 + $0x1], 1 }
 0x47a   :  { %745 = vsyncpa [#allocation7], 1 }
 0x47b   :  { %746 = vsyncpa [#allocation5], 1 }
 0x47c   :  { %748 = vsyncpa [#allocation5 + $0x1], 1 }
 0x47d   :  { %749 = vsyncpa [#allocation11], 1 }
 0x47e   :  { %751 = vsyncpa [#allocation11 + $0x1], 1 }

</bundles_post_ra>
